<compile_context>
chip_gen: v5e
topology: v5e:2x2
jax: 0.10.0
libtpu: 0.0.40
codegen_flags: <defaults>
</compile_context>

<pallas_src>
import functools

import jax
import jax.numpy as jnp
from jax.experimental import pallas as pl
from jax.experimental.pallas import tpu as pltpu


# ---------------------------------------------------------------------------
# pltpu.roll sign-convention probe (one tiny pallas_call, cached).
# The stencil needs out[p] = y[(p + s) % N].  With numpy convention
# (out[p] = y[(p - shift) % N]) that is shift = -s.  Resolving the convention
# at runtime keeps the stencil robust to either sign convention of the rotate.
# ---------------------------------------------------------------------------
_ROLL_NP_CONVENTION = None


def _roll_follows_numpy():
    global _ROLL_NP_CONVENTION
    if _ROLL_NP_CONVENTION is None:
        def kern(x_ref, o_ref):
            o_ref[...] = pltpu.roll(x_ref[...], 1, 1)

        x = jnp.tile(jnp.arange(128, dtype=jnp.float32)[None, :], (8, 1))
        out = pl.pallas_call(
            kern, out_shape=jax.ShapeDtypeStruct((8, 128), jnp.float32))(x)
        _ROLL_NP_CONVENTION = bool(out[0, 0] == 127.0)
    return _ROLL_NP_CONVENTION


# ---------------------------------------------------------------------------
# Fully fused kernel (per batch element):
#   qkv 1x1 conv -> depthwise 3x3 conv -> all-heads channel attention -> project_out
# Layout: (C, HW) in, (C, HW) out -- lane-dense, no transposes, no HBM intermediate.
# ---------------------------------------------------------------------------
def _fused_attention_kernel(H, W, np_roll,
                            x_ref, wq_ref, bq_ref, wd_ref, bd_ref,
                            wp_ref, bp_ref, temp_ref, mask_ref, o_ref):
    # x_ref : (1, C, HW)   wq_ref: (3C, C)   bq_ref: (3C, 1)
    # wd_ref: (9, 3C, 1)   bd_ref: (3C, 1)
    # wp_ref: (C, C)       bp_ref: (C, 1)
    # temp_ref: (C, 1) per-row (per-head) temperature
    # mask_ref: (C, C) additive block mask (0 on same-head blocks, -1e30 elsewhere)
    # o_ref : (1, C, HW)
    HW = H * W
    C = o_ref.shape[1]

    # ------------- 1x1 qkv conv (MXU, bf16 operands, f32 accumulation) -------------
    x = x_ref[0]
    y = jnp.dot(wq_ref[...].astype(jnp.bfloat16), x.astype(jnp.bfloat16),
                preferred_element_type=jnp.float32)                      # (3C, HW)
    y = y + bq_ref[...]

    # ------------- depthwise 3x3 conv, padding=1 (lane rolls + boundary masks) -----
    # TODO(synk): bf16 tap accumulation is ~2x on the binding VALU slot on v6e/v7x;
    #             kept f32 so the same kernel stays exact on v5e (no bf16 VPU).
    pos = jax.lax.broadcasted_iota(jnp.int32, (1, HW), 1)   # hoisted: div/mod only once
    row = pos // W
    col = pos % W
    m_top = (row >= 1).astype(jnp.float32)
    m_bot = (row <= H - 2).astype(jnp.float32)
    m_lft = (col >= 1).astype(jnp.float32)
    m_rgt = (col <= W - 2).astype(jnp.float32)
    row_masks = (m_top, None, m_bot)
    col_masks = (m_lft, None, m_rgt)

    acc = wd_ref[4] * y                      # center tap initializes the accumulator
    for di in range(3):
        for dj in range(3):
            if di == 1 and dj == 1:
                continue
            s = (di - 1) * W + (dj - 1)      # out[p] needs y[p + s]
            amt = (-s) % HW if np_roll else s % HW
            sh = pltpu.roll(y, amt, 1)       # XLU lane rotate (off the VALU slot)
            rm, cm = row_masks[di], col_masks[dj]
            if rm is None:
                m = cm
            elif cm is None:
                m = rm
            else:
                m = rm * cm                  # (1, HW) combine of hoisted edge masks
            acc = acc + wd_ref[di * 3 + dj] * (sh * m)
    y = acc + bd_ref[...]                                               # (3C, HW) f32

    # ------------- channel attention, all heads batched on C-wide MXU shapes -------
    q = y[0:C, :]
    k = y[C:2 * C, :]
    v = y[2 * C:3 * C, :]

    # Un-normalized gram on the MXU; L2 normalization applied afterwards on the tiny
    # (C, C) tile -- mathematically identical to normalizing q/k first.
    g = jax.lax.dot_general(q.astype(jnp.bfloat16), k.astype(jnp.bfloat16),
                            (((1,), (1,)), ((), ())),
                            preferred_element_type=jnp.float32)         # (C, C)
    eps2 = jnp.float32(1e-24)                # F.normalize: x / max(||x||_2, 1e-12)
    q_inv = jax.lax.rsqrt(jnp.maximum(jnp.sum(q * q, -1, keepdims=True), eps2))  # (C,1)
    k_inv = jax.lax.rsqrt(jnp.maximum(jnp.sum(k * k, -1, keepdims=True), eps2))  # (C,1)
    q_inv = q_inv * temp_ref[...]            # fold per-head temperature into row scale
    scale = jax.lax.dot_general(q_inv, k_inv, (((1,), (1,)), ((), ())),
                                preferred_element_type=jnp.float32)     # outer prod (C,C)

    # Block-diagonal softmax over all heads at once: cross-head entries get -1e30,
    # exp underflows to exactly 0, so each row only attends within its own head.
    a = g * scale + mask_ref[...]
    a = a - jnp.max(a, axis=-1, keepdims=True)
    p = jnp.exp(a)
    p = p / jnp.sum(p, axis=-1, keepdims=True)   # exact divide: (C,C) tile is tiny

    # Fold project_out into the attention by associativity:
    #   out = Wp @ (P_blockdiag @ V) = (Wp @ P_blockdiag) @ V  -> one wide matmul.
    m_proj = jnp.dot(wp_ref[...], p, preferred_element_type=jnp.float32)     # (C, C)
    out = jnp.dot(m_proj.astype(jnp.bfloat16), v.astype(jnp.bfloat16),
                  preferred_element_type=jnp.float32)                        # (C, HW)
    o_ref[0] = (out + bp_ref[...]).astype(o_ref.dtype)


def attention_forward(x_nchw, params, num_heads):
    """Forward pass of the Restormer channel-attention block (single fused Pallas kernel)."""
    del num_heads  # head structure is baked into temp_rows / neg_mask
    B, C, H, W = x_nchw.shape
    HW = H * W
    C3 = 3 * C
    x = x_nchw.reshape(B, C, HW)     # channel-major, HW-minor: free reshape, lane-dense
    kernel = functools.partial(_fused_attention_kernel, H, W, _roll_follows_numpy())
    out = pl.pallas_call(
        kernel,
        out_shape=jax.ShapeDtypeStruct((B, C, HW), x.dtype),
        grid=(B,),
        in_specs=[
            pl.BlockSpec((1, C, HW), lambda b: (b, 0, 0)),
            pl.BlockSpec((C3, C), lambda b: (0, 0)),
            pl.BlockSpec((C3, 1), lambda b: (0, 0)),
            pl.BlockSpec((9, C3, 1), lambda b: (0, 0, 0)),
            pl.BlockSpec((C3, 1), lambda b: (0, 0)),
            pl.BlockSpec((C, C), lambda b: (0, 0)),
            pl.BlockSpec((C, 1), lambda b: (0, 0)),
            pl.BlockSpec((C, 1), lambda b: (0, 0)),
            pl.BlockSpec((C, C), lambda b: (0, 0)),
        ],
        out_specs=pl.BlockSpec((1, C, HW), lambda b: (b, 0, 0)),
        compiler_params=pltpu.CompilerParams(
            dimension_semantics=("parallel",),
            vmem_limit_bytes=48 * 1024 * 1024),   # explicit: above v5e/v6e/v7x scoped defaults
    )(x, params["w_qkv"], params["b_qkv"], params["w_dw"], params["b_dw"],
      params["w_proj"], params["b_proj"], params["temp_rows"], params["neg_mask"])
    return out.reshape(B, C, H, W)


# ---------------------------------------------------------------------------
# Parameter relayout (PyTorch layouts -> kernel layouts)
# ---------------------------------------------------------------------------
def prepare_params(torch_params, num_heads):
    """Convert PyTorch-layout weights into the kernel-friendly layouts."""
    w_qkv = torch_params["w_qkv"][:, :, 0, 0].astype(jnp.float32)        # (3C, C)
    b_qkv = torch_params["b_qkv"][:, None].astype(jnp.float32)           # (3C, 1)
    wd = torch_params["w_dw"][:, 0]                                      # (3C, 3, 3)
    C3 = wd.shape[0]
    C = C3 // 3
    Ch = C // num_heads
    w_dw = jnp.transpose(wd, (1, 2, 0)).reshape(9, C3)[:, :, None]       # (9, 3C, 1)
    w_dw = w_dw.astype(jnp.float32)
    b_dw = torch_params["b_dw"][:, None].astype(jnp.float32)             # (3C, 1)
    w_proj = torch_params["w_proj"][:, :, 0, 0].astype(jnp.float32)      # (C, C)
    b_proj = torch_params["b_proj"][:, None].astype(jnp.float32)         # (C, 1)
    temperature = torch_params["temperature"][:, 0, 0]                   # (heads,)
    temp_rows = jnp.repeat(temperature, Ch)[:, None].astype(jnp.float32)  # (C, 1)
    head_id = jnp.arange(C, dtype=jnp.int32) // Ch
    neg_mask = jnp.where(head_id[:, None] == head_id[None, :],
                         0.0, -1e30).astype(jnp.float32)                 # (C, C)
    return {
        "w_qkv": w_qkv, "b_qkv": b_qkv, "w_dw": w_dw, "b_dw": b_dw,
        "w_proj": w_proj, "b_proj": b_proj,
        "temp_rows": temp_rows, "neg_mask": neg_mask,
    }


# ---------------------------------------------------------------------------
# Pure-JAX reference (straight transcription of the PyTorch module) for validation.
# ---------------------------------------------------------------------------
def reference_forward(x, tp, num_heads):
    B, C, H, W = x.shape
    HP = jax.lax.Precision.HIGHEST
    w_qkv = tp["w_qkv"][:, :, 0, 0]
    qkv = jnp.einsum("oc,bchw->bohw", w_qkv, x, precision=HP)
    qkv = qkv + tp["b_qkv"][None, :, None, None]
    qkv_p = jnp.pad(qkv, ((0, 0), (0, 0), (1, 1), (1, 1)))
    wd = tp["w_dw"][:, 0]
    dw = jnp.zeros_like(qkv)
    for di in range(3):
        for dj in range(3):
            dw = dw + qkv_p[:, :, di:di + H, dj:dj + W] * wd[None, :, di, dj, None, None]
    dw = dw + tp["b_dw"][None, :, None, None]
    Ch = C // num_heads
    q, k, v = jnp.split(dw.reshape(B, 3 * C, H * W), 3, axis=1)
    to_heads = lambda t: t.reshape(B, num_heads, Ch, H * W)
    q, k, v = to_heads(q), to_heads(k), to_heads(v)
    qn = q / jnp.maximum(jnp.sqrt(jnp.sum(q * q, axis=-1, keepdims=True)), 1e-12)
    kn = k / jnp.maximum(jnp.sqrt(jnp.sum(k * k, axis=-1, keepdims=True)), 1e-12)
    attn = jnp.einsum("bhcx,bhdx->bhcd", qn, kn, precision=HP)
    attn = attn * tp["temperature"][None]
    attn = jax.nn.softmax(attn, axis=-1)
    out = jnp.einsum("bhcd,bhdx->bhcx", attn, v, precision=HP).reshape(B, C, H * W)
    w_p = tp["w_proj"][:, :, 0, 0]
    out = jnp.einsum("oc,bcx->box", w_p, out, precision=HP) + tp["b_proj"][None, :, None]
    return out.reshape(B, C, H, W)


if __name__ == "__main__":
    B, dim, H, W = 2, 8, 16, 16
    num_heads = 2

    key = jax.random.PRNGKey(0)
    ks = jax.random.split(key, 7)
    x = jax.random.normal(ks[0], (B, dim, H, W), jnp.float32)

    # Parameters in their native PyTorch layouts (bias=True).
    torch_params = {
        "w_qkv": 0.1 * jax.random.normal(ks[1], (3 * dim, dim, 1, 1), jnp.float32),
        "b_qkv": 0.1 * jax.random.normal(ks[2], (3 * dim,), jnp.float32),
        "w_dw": 0.1 * jax.random.normal(ks[3], (3 * dim, 1, 3, 3), jnp.float32),
        "b_dw": 0.1 * jax.random.normal(ks[4], (3 * dim,), jnp.float32),
        "w_proj": 0.1 * jax.random.normal(ks[5], (dim, dim, 1, 1), jnp.float32),
        "b_proj": 0.1 * jax.random.normal(ks[6], (dim,), jnp.float32),
        "temperature": jnp.ones((num_heads, 1, 1), jnp.float32),
    }

    params = prepare_params(torch_params, num_heads)
    out = attention_forward(x, params, num_heads)
    out = jax.block_until_ready(out)
    assert out.shape == (B, dim, H, W) and out.dtype == jnp.float32

    ref = jax.block_until_ready(reference_forward(x, torch_params, num_heads))
    if not jnp.allclose(out, ref, atol=1e-2, rtol=1e-2):
        err = float(jnp.max(jnp.abs(out - ref)))
        raise AssertionError(f"Pallas output mismatch vs reference: max abs err = {err}")

    print("KERNEL_OK")
</pallas_src>

<mosaic_0001>
module attributes {stable_mosaic.version = 11 : i64} {
  func.func @kern(%arg0: memref<8x128xf32, #tpu.memory_space<vmem>>, %arg1: memref<8x128xf32, #tpu.memory_space<vmem>>) attributes {dimension_semantics = [], scalar_prefetch = 0 : i64, scratch_operands = 0 : i64, tpu.core_type = #tpu.core_type<tc>} {
    %c0 = arith.constant 0 : index
    %c0_0 = arith.constant 0 : index
    %0 = vector.load %arg0[%c0, %c0_0] : memref<8x128xf32, #tpu.memory_space<vmem>>, vector<8x128xf32>
    %c1_i32 = arith.constant 1 : i32
    %1 = tpu.dynamic_rotate %0 by %c1_i32 dim 1 : vector<8x128xf32>, i32 -> vector<8x128xf32>
    %c0_1 = arith.constant 0 : index
    %c0_2 = arith.constant 0 : index
    %2 = vector.load %arg1[%c0_1, %c0_2] : memref<8x128xf32, #tpu.memory_space<vmem>>, vector<8x128xf32>
    tpu.vector_store %arg1[%c0_1, %c0_2], %1 {strides = array<i32>} : memref<8x128xf32, #tpu.memory_space<vmem>>, vector<8x128xf32>,
    return
  }
}

</mosaic_0001>

<bundles_post_ra>
// kernel: tpu_custom_call.1
= control target key start
LH: loop header
LB: loop body
LE: loop exit
PB: predicated region body
PF: predicated region fallthrough
CT: control target
= control target key end

     0   :  { %6 = vsyncpa [#allocation3], 0  ;;  %s118_s0 = inlined_call_operand.hbm [shape: f32[8,128], index: 0, kind: input, shape index: {}]   ;;  %s119_s1 = inlined_call_operand.hbm [shape: f32[8,128], index: 1, kind: output, shape index: {}]  }
   0x1   :  { %7 = vsyncpa [#allocation4], 0  ;;  %s13_s8 = sshll.u32 %s118_s0, 4  ;;  %s99_s9 = smov [#allocation2]   ;;  %s14_s8 = int_to_ptr.hbm [resolvable:$true] %s13_s8 }
   0x2   :  { %s15_s10 = sshll.u32 %s99_s9, 4  ;;  %s16_s10 = int_to_ptr.vmem [resolvable:$true] %s15_s10 }
   0x3   :  { %18 = dma.hbm_to_vmem [thread:$0]  %s14_s8, 128, %s16_s10, [#allocation3]  }
   0x4   :  { %95 = dma.done.wait [#allocation3], 128  }
   0x5   :  { %96 = vsyncadd [#allocation3], 4294967168  ;;  %v23_v0 = vld [vmem:[#allocation2] sm:$0xff]  ;;  %s100_s11 = smov 1   ;;  %s101_s12 = smov [#allocation5]  }
   0x6   :  { %24 = vrot.lane.b32.xlu0 %v23_v0, %s100_s11  ;;  %s32_s13 = sshll.u32 %s101_s12, 4  ;;  %s34_s16 = sshll.u32 %s119_s1, 4  ;;  %s33_s13 = int_to_ptr.vmem [resolvable:$true] %s32_s13  ;;  %s35_s16 = int_to_ptr.hbm [resolvable:$true] %s34_s16 }
  0x78   :  { %v25_v1 = vpop.permute.xlu0 %24 }
  0x79   :  { %26 = vst [vmem:[#allocation5] sm:$0xff] %v25_v1 }
  0x7a   :  { %37 = dma.vmem_to_hbm [thread:$0]  %s33_s13, 128, %s35_s16, [#allocation4]  }
  0x7b   :  { %97 = dma.done.wait [#allocation4], 128  }
  0x7c   :  { %98 = vsyncadd [#allocation4], 4294967168 }
  0x7d   :  { %42 = vsyncpa [#allocation3], 1 }
  0x7e   :  { %43 = vsyncpa [#allocation4], 1 }

</bundles_post_ra>
